<compile_context>
chip_gen: v6e
topology: v6e:2x2x1
jax: 0.10.0
libtpu: 0.0.40
codegen_flags: <defaults>
</compile_context>

<pallas_src>
import functools

import jax
import jax.numpy as jnp
from jax.experimental import pallas as pl
from jax.experimental.pallas import tpu as pltpu


def _tsmixer_kernel(x_ref, w1_ref, b1_ref, w2_ref, b2_ref,
                    w3_ref, b3_ref, w4_ref, b4_ref,
                    wp_ref, bp_ref, o_ref, *, n_layers, nc):
    L = x_ref.shape[1]
    C = x_ref.shape[2]
    P = o_ref.shape[2]

    x = x_ref[...].astype(jnp.float32)                          # [nc, L, C]

    for e in range(n_layers):                                   # static unroll
        # ---- temporal mixing: one [nc*C, L] @ [L, D] matmul --------------
        xt = jnp.swapaxes(x, 1, 2).reshape(nc * C, L)            # [nc*C, L]
        h = jnp.maximum(
            jnp.dot(xt, w1_ref[e], preferred_element_type=jnp.float32)
            + b1_ref[e], 0.0)                                    # [nc*C, D]
        t2 = (jnp.dot(h, w2_ref[e], preferred_element_type=jnp.float32)
              + b2_ref[e])                                       # [nc*C, L]
        x = x + jnp.swapaxes(t2.reshape(nc, C, L), 1, 2)         # [nc, L, C]

        # ---- channel mixing: one [nc*L, C] @ [C, D] matmul ---------------
        xl = x.reshape(nc * L, C)                                # [nc*L, C]
        h2 = jnp.maximum(
            jnp.dot(xl, w3_ref[e], preferred_element_type=jnp.float32)
            + b3_ref[e], 0.0)                                    # [nc*L, D]
        ch = (jnp.dot(h2, w4_ref[e], preferred_element_type=jnp.float32)
              + b4_ref[e])                                       # [nc*L, C]
        x = x + ch.reshape(nc, L, C)                             # [nc, L, C]

    # ---- projection: Linear(seq_len -> pred_len) along the time axis -----
    xt = jnp.swapaxes(x, 1, 2).reshape(nc * C, L)                # [nc*C, L]
    p = (jnp.dot(xt, wp_ref[...], preferred_element_type=jnp.float32)
         + bp_ref[...])                                          # [nc*C, P]
    o_ref[...] = p.reshape(nc, C, P).astype(o_ref.dtype)         # [nc, C, P]


def prepare_kernel_params(params):
    """Transpose/stack PyTorch-layout params once, host side (no in-kernel .T)."""
    (w1, b1, w2, b2, w3, b3, w4, b4, wp, bp) = params
    return (
        jnp.transpose(w1, (0, 2, 1)), b1[:, None, :],   # [E, L, D], [E, 1, D]
        jnp.transpose(w2, (0, 2, 1)), b2[:, None, :],   # [E, D, L], [E, 1, L]
        jnp.transpose(w3, (0, 2, 1)), b3[:, None, :],   # [E, C, D], [E, 1, D]
        jnp.transpose(w4, (0, 2, 1)), b4[:, None, :],   # [E, D, C], [E, 1, C]
        wp.T, bp[None, :],                              # [L, P],    [1, P]
    )


def tsmixer_forward(x_enc, kparams, *, n_layers, pred_len):
    """x_enc: [B, G, L, C] float32 -> [B, G, pred_len, C]."""
    B, G, L, C = x_enc.shape
    N = B * G
    x_flat = x_enc.reshape(N, L, C)

    (w1t, b1, w2t, b2, w3t, b3, w4t, b4, wpt, bp) = kparams
    P = wpt.shape[1]

    # >= 2 parallel grid chunks so both TensorCores get work on dual-TC parts;
    # each chunk batches nc samples into the matmul M dimension.
    num_chunks = 2 if (N >= 2 and N % 2 == 0) else 1
    nc = N // num_chunks

    full = lambda a: pl.BlockSpec(a.shape, lambda i: (0,) * a.ndim)

    kernel = functools.partial(_tsmixer_kernel, n_layers=n_layers, nc=nc)

    out_ncp = pl.pallas_call(
        kernel,
        out_shape=jax.ShapeDtypeStruct((N, C, P), x_enc.dtype),
        grid_spec=pltpu.PrefetchScalarGridSpec(
            num_scalar_prefetch=0,
            grid=(num_chunks,),
            in_specs=[
                pl.BlockSpec((nc, L, C), lambda i: (i, 0, 0)),
                full(w1t), full(b1), full(w2t), full(b2),
                full(w3t), full(b3), full(w4t), full(b4),
                full(wpt), full(bp),
            ],
            out_specs=pl.BlockSpec((nc, C, P), lambda i: (i, 0, 0)),
        ),
        compiler_params=pltpu.CompilerParams(
            dimension_semantics=("parallel",)),
    )(x_flat, w1t, b1, w2t, b2, w3t, b3, w4t, b4, wpt, bp)

    # [N, C, P] -> [B, G, P, C]  (tiny XLA-side reorder of the final output)
    out = jnp.swapaxes(out_ncp, 1, 2).reshape(B, G, P, C)
    # forward(): dec_out[:, :, -pred_len:, :]  (projection already emits pred_len)
    return out[:, :, -pred_len:, :]


def init_params(key, *, n_layers, seq_len, enc_in, d_model, pred_len):
    """Deterministic init mimicking nn.Linear default (uniform +-1/sqrt(fan_in)).

    Returns PyTorch-layout params:
      w1 [E, D, L], b1 [E, D]   temporal Linear(seq_len -> d_model)
      w2 [E, L, D], b2 [E, L]   temporal Linear(d_model -> seq_len)
      w3 [E, D, C], b3 [E, D]   channel  Linear(enc_in  -> d_model)
      w4 [E, C, D], b4 [E, C]   channel  Linear(d_model -> enc_in)
      wp [P, L],    bp [P]      projection Linear(seq_len -> pred_len)
    """
    keys = jax.random.split(key, 8 * n_layers + 2)
    ki = iter(range(len(keys)))

    def lin(k_w, k_b, out_f, in_f):
        bound = 1.0 / jnp.sqrt(jnp.float32(in_f))
        w = jax.random.uniform(k_w, (out_f, in_f), jnp.float32, -bound, bound)
        b = jax.random.uniform(k_b, (out_f,), jnp.float32, -bound, bound)
        return w, b

    w1l, b1l, w2l, b2l, w3l, b3l, w4l, b4l = ([] for _ in range(8))
    for _ in range(n_layers):
        w, b = lin(keys[next(ki)], keys[next(ki)], d_model, seq_len)
        w1l.append(w); b1l.append(b)
        w, b = lin(keys[next(ki)], keys[next(ki)], seq_len, d_model)
        w2l.append(w); b2l.append(b)
        w, b = lin(keys[next(ki)], keys[next(ki)], d_model, enc_in)
        w3l.append(w); b3l.append(b)
        w, b = lin(keys[next(ki)], keys[next(ki)], enc_in, d_model)
        w4l.append(w); b4l.append(b)
    wp, bp = lin(keys[next(ki)], keys[next(ki)], pred_len, seq_len)

    return (jnp.stack(w1l), jnp.stack(b1l), jnp.stack(w2l), jnp.stack(b2l),
            jnp.stack(w3l), jnp.stack(b3l), jnp.stack(w4l), jnp.stack(b4l),
            wp, bp)


def reference_forward(x, params, *, n_layers, pred_len):
    """Pure-JAX reference matching the PyTorch module (eval mode)."""
    (w1, b1, w2, b2, w3, b3, w4, b4, wp, bp) = params
    for e in range(n_layers):
        t = jnp.swapaxes(x, 2, 3)                              # [B,G,C,L]
        h = jax.nn.relu(t @ w1[e].T + b1[e])                   # [B,G,C,D]
        t2 = h @ w2[e].T + b2[e]                               # [B,G,C,L]
        x = x + jnp.swapaxes(t2, 2, 3)
        h2 = jax.nn.relu(x @ w3[e].T + b3[e])                  # [B,G,L,D]
        x = x + (h2 @ w4[e].T + b4[e])                         # [B,G,L,C]
    t = jnp.swapaxes(x, 2, 3)                                  # [B,G,C,L]
    p = t @ wp.T + bp                                          # [B,G,C,P]
    out = jnp.swapaxes(p, 2, 3)                                # [B,G,P,C]
    return out[:, :, -pred_len:, :]


if __name__ == "__main__":
    # configs: task_name='long_term_forecast', e_layers=2, seq_len=8,
    #          pred_len=4, enc_in=4, d_model=32, dropout=0.0 (eval)
    B, G, L, C = 2, 3, 8, 4
    D, P, E = 32, 4, 2

    key = jax.random.PRNGKey(0)
    k_x, k_p = jax.random.split(key)
    x_enc = jax.random.normal(k_x, (B, G, L, C), jnp.float32)
    params = init_params(k_p, n_layers=E, seq_len=L, enc_in=C,
                         d_model=D, pred_len=P)
    kparams = prepare_kernel_params(params)

    out = tsmixer_forward(x_enc, kparams, n_layers=E, pred_len=P)
    out = jax.block_until_ready(out)

    ref = reference_forward(x_enc, params, n_layers=E, pred_len=P)
    assert out.shape == (B, G, P, C)
    assert jnp.allclose(out, ref, atol=1e-4, rtol=1e-4), "mismatch vs reference"

    # TODO(synk): nn.Dropout is identity here (eval-mode inference); training-mode
    # dropout would need pltpu.prng_seed/prng_random_bits masks.
    print("KERNEL_OK")
</pallas_src>

<mosaic_0001>
module attributes {stable_mosaic.version = 11 : i64} {
  func.func @_tsmixer_kernel(%arg0: i32, %arg1: memref<3x8x4xf32, #tpu.memory_space<vmem>>, %arg2: memref<2x8x32xf32, #tpu.memory_space<vmem>>, %arg3: memref<2x1x32xf32, #tpu.memory_space<vmem>>, %arg4: memref<2x32x8xf32, #tpu.memory_space<vmem>>, %arg5: memref<2x1x8xf32, #tpu.memory_space<vmem>>, %arg6: memref<2x4x32xf32, #tpu.memory_space<vmem>>, %arg7: memref<2x1x32xf32, #tpu.memory_space<vmem>>, %arg8: memref<2x32x4xf32, #tpu.memory_space<vmem>>, %arg9: memref<2x1x4xf32, #tpu.memory_space<vmem>>, %arg10: memref<8x4xf32, #tpu.memory_space<vmem>>, %arg11: memref<1x4xf32, #tpu.memory_space<vmem>>, %arg12: memref<3x4x4xf32, #tpu.memory_space<vmem>>) attributes {dimension_semantics = [#tpu.dimension_semantics<parallel>], iteration_bounds = array<i64: 2>, scalar_prefetch = 0 : i64, scratch_operands = 0 : i64, tpu.core_type = #tpu.core_type<tc>, window_params = [{transform_indices = @transform_0, window_bounds = array<i64: 3, 8, 4>}, {pipeline_mode = #tpu.pipeline_mode<synchronous>, transform_indices = @transform_1, window_bounds = array<i64: 2, 8, 32>}, {pipeline_mode = #tpu.pipeline_mode<synchronous>, transform_indices = @transform_2, window_bounds = array<i64: 2, 1, 32>}, {pipeline_mode = #tpu.pipeline_mode<synchronous>, transform_indices = @transform_3, window_bounds = array<i64: 2, 32, 8>}, {pipeline_mode = #tpu.pipeline_mode<synchronous>, transform_indices = @transform_4, window_bounds = array<i64: 2, 1, 8>}, {pipeline_mode = #tpu.pipeline_mode<synchronous>, transform_indices = @transform_5, window_bounds = array<i64: 2, 4, 32>}, {pipeline_mode = #tpu.pipeline_mode<synchronous>, transform_indices = @transform_6, window_bounds = array<i64: 2, 1, 32>}, {pipeline_mode = #tpu.pipeline_mode<synchronous>, transform_indices = @transform_7, window_bounds = array<i64: 2, 32, 4>}, {pipeline_mode = #tpu.pipeline_mode<synchronous>, transform_indices = @transform_8, window_bounds = array<i64: 2, 1, 4>}, {pipeline_mode = #tpu.pipeline_mode<synchronous>, transform_indices = @transform_9, window_bounds = array<i64: 8, 4>}, {pipeline_mode = #tpu.pipeline_mode<synchronous>, transform_indices = @transform_10, window_bounds = array<i64: 1, 4>}, {transform_indices = @transform_11, window_bounds = array<i64: 3, 4, 4>}]} {
    %c0 = arith.constant 0 : index
    %c0_0 = arith.constant 0 : index
    %c0_1 = arith.constant 0 : index
    %0 = vector.load %arg1[%c0, %c0_0, %c0_1] : memref<3x8x4xf32, #tpu.memory_space<vmem>>, vector<3x8x4xf32>
    %1 = tpu.transpose %0, [0, 2, 1] : vector<3x8x4xf32> -> vector<3x4x8xf32>
    %2 = vector.shape_cast %1 : vector<3x4x8xf32> to vector<12x8xf32>
    %c0_2 = arith.constant 0 : index
    %c0_3 = arith.constant 0 : index
    %c0_4 = arith.constant 0 : index
    %3 = vector.load %arg2[%c0_2, %c0_3, %c0_4] : memref<2x8x32xf32, #tpu.memory_space<vmem>>, vector<1x8x32xf32>
    %4 = vector.shape_cast %3 : vector<1x8x32xf32> to vector<8x32xf32>
    %cst = arith.constant dense<0.000000e+00> : vector<12x32xf32>
    %5 = tpu.matmul %2, %4, %cst {dimension_numbers = #tpu.dot_dimension_numbers<[1], [0], [0], [1], [0, 0, 1, 1], [], []>} : vector<12x8xf32>, vector<8x32xf32>, vector<12x32xf32> -> vector<12x32xf32>
    %c0_5 = arith.constant 0 : index
    %c0_6 = arith.constant 0 : index
    %c0_7 = arith.constant 0 : index
    %6 = vector.load %arg3[%c0_5, %c0_6, %c0_7] : memref<2x1x32xf32, #tpu.memory_space<vmem>>, vector<1x1x32xf32>
    %7 = vector.shape_cast %6 : vector<1x1x32xf32> to vector<1x32xf32>
    %8 = vector.broadcast %7 : vector<1x32xf32> to vector<12x32xf32>
    %9 = arith.addf %5, %8 : vector<12x32xf32>
    %cst_8 = arith.constant 0.000000e+00 : f32
    %10 = vector.broadcast %cst_8 : f32 to vector<12x32xf32>
    %11 = arith.maximumf %9, %10 : vector<12x32xf32>
    %c0_9 = arith.constant 0 : index
    %c0_10 = arith.constant 0 : index
    %c0_11 = arith.constant 0 : index
    %12 = vector.load %arg4[%c0_9, %c0_10, %c0_11] : memref<2x32x8xf32, #tpu.memory_space<vmem>>, vector<1x32x8xf32>
    %13 = vector.shape_cast %12 : vector<1x32x8xf32> to vector<32x8xf32>
    %cst_12 = arith.constant dense<0.000000e+00> : vector<12x8xf32>
    %14 = tpu.matmul %11, %13, %cst_12 {dimension_numbers = #tpu.dot_dimension_numbers<[1], [0], [0], [1], [0, 0, 1, 1], [], []>} : vector<12x32xf32>, vector<32x8xf32>, vector<12x8xf32> -> vector<12x8xf32>
    %c0_13 = arith.constant 0 : index
    %c0_14 = arith.constant 0 : index
    %c0_15 = arith.constant 0 : index
    %15 = vector.load %arg5[%c0_13, %c0_14, %c0_15] : memref<2x1x8xf32, #tpu.memory_space<vmem>>, vector<1x1x8xf32>
    %16 = vector.shape_cast %15 : vector<1x1x8xf32> to vector<1x8xf32>
    %17 = vector.broadcast %16 : vector<1x8xf32> to vector<12x8xf32>
    %18 = arith.addf %14, %17 : vector<12x8xf32>
    %19 = vector.shape_cast %18 : vector<12x8xf32> to vector<3x4x8xf32>
    %20 = tpu.transpose %19, [0, 2, 1] : vector<3x4x8xf32> -> vector<3x8x4xf32>
    %21 = arith.addf %0, %20 : vector<3x8x4xf32>
    %22 = vector.shape_cast %21 : vector<3x8x4xf32> to vector<24x4xf32>
    %c0_16 = arith.constant 0 : index
    %c0_17 = arith.constant 0 : index
    %c0_18 = arith.constant 0 : index
    %23 = vector.load %arg6[%c0_16, %c0_17, %c0_18] : memref<2x4x32xf32, #tpu.memory_space<vmem>>, vector<1x4x32xf32>
    %24 = vector.shape_cast %23 : vector<1x4x32xf32> to vector<4x32xf32>
    %cst_19 = arith.constant dense<0.000000e+00> : vector<24x32xf32>
    %25 = tpu.matmul %22, %24, %cst_19 {dimension_numbers = #tpu.dot_dimension_numbers<[1], [0], [0], [1], [0, 0, 1, 1], [], []>} : vector<24x4xf32>, vector<4x32xf32>, vector<24x32xf32> -> vector<24x32xf32>
    %c0_20 = arith.constant 0 : index
    %c0_21 = arith.constant 0 : index
    %c0_22 = arith.constant 0 : index
    %26 = vector.load %arg7[%c0_20, %c0_21, %c0_22] : memref<2x1x32xf32, #tpu.memory_space<vmem>>, vector<1x1x32xf32>
    %27 = vector.shape_cast %26 : vector<1x1x32xf32> to vector<1x32xf32>
    %28 = vector.broadcast %27 : vector<1x32xf32> to vector<24x32xf32>
    %29 = arith.addf %25, %28 : vector<24x32xf32>
    %cst_23 = arith.constant 0.000000e+00 : f32
    %30 = vector.broadcast %cst_23 : f32 to vector<24x32xf32>
    %31 = arith.maximumf %29, %30 : vector<24x32xf32>
    %c0_24 = arith.constant 0 : index
    %c0_25 = arith.constant 0 : index
    %c0_26 = arith.constant 0 : index
    %32 = vector.load %arg8[%c0_24, %c0_25, %c0_26] : memref<2x32x4xf32, #tpu.memory_space<vmem>>, vector<1x32x4xf32>
    %33 = vector.shape_cast %32 : vector<1x32x4xf32> to vector<32x4xf32>
    %cst_27 = arith.constant dense<0.000000e+00> : vector<24x4xf32>
    %34 = tpu.matmul %31, %33, %cst_27 {dimension_numbers = #tpu.dot_dimension_numbers<[1], [0], [0], [1], [0, 0, 1, 1], [], []>} : vector<24x32xf32>, vector<32x4xf32>, vector<24x4xf32> -> vector<24x4xf32>
    %c0_28 = arith.constant 0 : index
    %c0_29 = arith.constant 0 : index
    %c0_30 = arith.constant 0 : index
    %35 = vector.load %arg9[%c0_28, %c0_29, %c0_30] : memref<2x1x4xf32, #tpu.memory_space<vmem>>, vector<1x1x4xf32>
    %36 = vector.shape_cast %35 : vector<1x1x4xf32> to vector<1x4xf32>
    %37 = vector.broadcast %36 : vector<1x4xf32> to vector<24x4xf32>
    %38 = arith.addf %34, %37 : vector<24x4xf32>
    %39 = vector.shape_cast %38 : vector<24x4xf32> to vector<3x8x4xf32>
    %40 = arith.addf %21, %39 : vector<3x8x4xf32>
    %41 = tpu.transpose %40, [0, 2, 1] : vector<3x8x4xf32> -> vector<3x4x8xf32>
    %42 = vector.shape_cast %41 : vector<3x4x8xf32> to vector<12x8xf32>
    %c1 = arith.constant 1 : index
    %c0_31 = arith.constant 0 : index
    %c0_32 = arith.constant 0 : index
    %43 = vector.load %arg2[%c1, %c0_31, %c0_32] : memref<2x8x32xf32, #tpu.memory_space<vmem>>, vector<1x8x32xf32>
    %44 = vector.shape_cast %43 : vector<1x8x32xf32> to vector<8x32xf32>
    %cst_33 = arith.constant dense<0.000000e+00> : vector<12x32xf32>
    %45 = tpu.matmul %42, %44, %cst_33 {dimension_numbers = #tpu.dot_dimension_numbers<[1], [0], [0], [1], [0, 0, 1, 1], [], []>} : vector<12x8xf32>, vector<8x32xf32>, vector<12x32xf32> -> vector<12x32xf32>
    %c1_34 = arith.constant 1 : index
    %c0_35 = arith.constant 0 : index
    %c0_36 = arith.constant 0 : index
    %46 = vector.load %arg3[%c1_34, %c0_35, %c0_36] : memref<2x1x32xf32, #tpu.memory_space<vmem>>, vector<1x1x32xf32>
    %47 = vector.shape_cast %46 : vector<1x1x32xf32> to vector<1x32xf32>
    %48 = vector.broadcast %47 : vector<1x32xf32> to vector<12x32xf32>
    %49 = arith.addf %45, %48 : vector<12x32xf32>
    %cst_37 = arith.constant 0.000000e+00 : f32
    %50 = vector.broadcast %cst_37 : f32 to vector<12x32xf32>
    %51 = arith.maximumf %49, %50 : vector<12x32xf32>
    %c1_38 = arith.constant 1 : index
    %c0_39 = arith.constant 0 : index
    %c0_40 = arith.constant 0 : index
    %52 = vector.load %arg4[%c1_38, %c0_39, %c0_40] : memref<2x32x8xf32, #tpu.memory_space<vmem>>, vector<1x32x8xf32>
    %53 = vector.shape_cast %52 : vector<1x32x8xf32> to vector<32x8xf32>
    %cst_41 = arith.constant dense<0.000000e+00> : vector<12x8xf32>
    %54 = tpu.matmul %51, %53, %cst_41 {dimension_numbers = #tpu.dot_dimension_numbers<[1], [0], [0], [1], [0, 0, 1, 1], [], []>} : vector<12x32xf32>, vector<32x8xf32>, vector<12x8xf32> -> vector<12x8xf32>
    %c1_42 = arith.constant 1 : index
    %c0_43 = arith.constant 0 : index
    %c0_44 = arith.constant 0 : index
    %55 = vector.load %arg5[%c1_42, %c0_43, %c0_44] : memref<2x1x8xf32, #tpu.memory_space<vmem>>, vector<1x1x8xf32>
    %56 = vector.shape_cast %55 : vector<1x1x8xf32> to vector<1x8xf32>
    %57 = vector.broadcast %56 : vector<1x8xf32> to vector<12x8xf32>
    %58 = arith.addf %54, %57 : vector<12x8xf32>
    %59 = vector.shape_cast %58 : vector<12x8xf32> to vector<3x4x8xf32>
    %60 = tpu.transpose %59, [0, 2, 1] : vector<3x4x8xf32> -> vector<3x8x4xf32>
    %61 = arith.addf %40, %60 : vector<3x8x4xf32>
    %62 = vector.shape_cast %61 : vector<3x8x4xf32> to vector<24x4xf32>
    %c1_45 = arith.constant 1 : index
    %c0_46 = arith.constant 0 : index
    %c0_47 = arith.constant 0 : index
    %63 = vector.load %arg6[%c1_45, %c0_46, %c0_47] : memref<2x4x32xf32, #tpu.memory_space<vmem>>, vector<1x4x32xf32>
    %64 = vector.shape_cast %63 : vector<1x4x32xf32> to vector<4x32xf32>
    %cst_48 = arith.constant dense<0.000000e+00> : vector<24x32xf32>
    %65 = tpu.matmul %62, %64, %cst_48 {dimension_numbers = #tpu.dot_dimension_numbers<[1], [0], [0], [1], [0, 0, 1, 1], [], []>} : vector<24x4xf32>, vector<4x32xf32>, vector<24x32xf32> -> vector<24x32xf32>
    %c1_49 = arith.constant 1 : index
    %c0_50 = arith.constant 0 : index
    %c0_51 = arith.constant 0 : index
    %66 = vector.load %arg7[%c1_49, %c0_50, %c0_51] : memref<2x1x32xf32, #tpu.memory_space<vmem>>, vector<1x1x32xf32>
    %67 = vector.shape_cast %66 : vector<1x1x32xf32> to vector<1x32xf32>
    %68 = vector.broadcast %67 : vector<1x32xf32> to vector<24x32xf32>
    %69 = arith.addf %65, %68 : vector<24x32xf32>
    %cst_52 = arith.constant 0.000000e+00 : f32
    %70 = vector.broadcast %cst_52 : f32 to vector<24x32xf32>
    %71 = arith.maximumf %69, %70 : vector<24x32xf32>
    %c1_53 = arith.constant 1 : index
    %c0_54 = arith.constant 0 : index
    %c0_55 = arith.constant 0 : index
    %72 = vector.load %arg8[%c1_53, %c0_54, %c0_55] : memref<2x32x4xf32, #tpu.memory_space<vmem>>, vector<1x32x4xf32>
    %73 = vector.shape_cast %72 : vector<1x32x4xf32> to vector<32x4xf32>
    %cst_56 = arith.constant dense<0.000000e+00> : vector<24x4xf32>
    %74 = tpu.matmul %71, %73, %cst_56 {dimension_numbers = #tpu.dot_dimension_numbers<[1], [0], [0], [1], [0, 0, 1, 1], [], []>} : vector<24x32xf32>, vector<32x4xf32>, vector<24x4xf32> -> vector<24x4xf32>
    %c1_57 = arith.constant 1 : index
    %c0_58 = arith.constant 0 : index
    %c0_59 = arith.constant 0 : index
    %75 = vector.load %arg9[%c1_57, %c0_58, %c0_59] : memref<2x1x4xf32, #tpu.memory_space<vmem>>, vector<1x1x4xf32>
    %76 = vector.shape_cast %75 : vector<1x1x4xf32> to vector<1x4xf32>
    %77 = vector.broadcast %76 : vector<1x4xf32> to vector<24x4xf32>
    %78 = arith.addf %74, %77 : vector<24x4xf32>
    %79 = vector.shape_cast %78 : vector<24x4xf32> to vector<3x8x4xf32>
    %80 = arith.addf %61, %79 : vector<3x8x4xf32>
    %81 = tpu.transpose %80, [0, 2, 1] : vector<3x8x4xf32> -> vector<3x4x8xf32>
    %82 = vector.shape_cast %81 : vector<3x4x8xf32> to vector<12x8xf32>
    %c0_60 = arith.constant 0 : index
    %c0_61 = arith.constant 0 : index
    %83 = vector.load %arg10[%c0_60, %c0_61] : memref<8x4xf32, #tpu.memory_space<vmem>>, vector<8x4xf32>
    %cst_62 = arith.constant dense<0.000000e+00> : vector<12x4xf32>
    %84 = tpu.matmul %82, %83, %cst_62 {dimension_numbers = #tpu.dot_dimension_numbers<[1], [0], [0], [1], [0, 0, 1, 1], [], []>} : vector<12x8xf32>, vector<8x4xf32>, vector<12x4xf32> -> vector<12x4xf32>
    %c0_63 = arith.constant 0 : index
    %c0_64 = arith.constant 0 : index
    %85 = vector.load %arg11[%c0_63, %c0_64] : memref<1x4xf32, #tpu.memory_space<vmem>>, vector<1x4xf32>
    %86 = vector.broadcast %85 : vector<1x4xf32> to vector<12x4xf32>
    %87 = arith.addf %84, %86 : vector<12x4xf32>
    %88 = vector.shape_cast %87 : vector<12x4xf32> to vector<3x4x4xf32>
    %c0_65 = arith.constant 0 : index
    %c0_66 = arith.constant 0 : index
    %c0_67 = arith.constant 0 : index
    %89 = vector.load %arg12[%c0_65, %c0_66, %c0_67] : memref<3x4x4xf32, #tpu.memory_space<vmem>>, vector<3x4x4xf32>
    tpu.vector_store %arg12[%c0_65, %c0_66, %c0_67], %88 {strides = array<i32>} : memref<3x4x4xf32, #tpu.memory_space<vmem>>, vector<3x4x4xf32>,
    return
  }
  func.func @transform_0(%arg0: i32) -> (i32, i32, i32) {
    %c0_i32 = arith.constant 0 : i32
    %c0_i32_0 = arith.constant 0 : i32
    %c0_i32_1 = arith.constant 0 : i32
    return %arg0, %c0_i32, %c0_i32_0 : i32, i32, i32
  }
  func.func @transform_1(%arg0: i32) -> (i32, i32, i32) {
    %c0_i32 = arith.constant 0 : i32
    %c0_i32_0 = arith.constant 0 : i32
    %c0_i32_1 = arith.constant 0 : i32
    %c0_i32_2 = arith.constant 0 : i32
    return %c0_i32, %c0_i32_0, %c0_i32_1 : i32, i32, i32
  }
  func.func @transform_2(%arg0: i32) -> (i32, i32, i32) {
    %c0_i32 = arith.constant 0 : i32
    %c0_i32_0 = arith.constant 0 : i32
    %c0_i32_1 = arith.constant 0 : i32
    %c0_i32_2 = arith.constant 0 : i32
    return %c0_i32, %c0_i32_0, %c0_i32_1 : i32, i32, i32
  }
  func.func @transform_3(%arg0: i32) -> (i32, i32, i32) {
    %c0_i32 = arith.constant 0 : i32
    %c0_i32_0 = arith.constant 0 : i32
    %c0_i32_1 = arith.constant 0 : i32
    %c0_i32_2 = arith.constant 0 : i32
    return %c0_i32, %c0_i32_0, %c0_i32_1 : i32, i32, i32
  }
  func.func @transform_4(%arg0: i32) -> (i32, i32, i32) {
    %c0_i32 = arith.constant 0 : i32
    %c0_i32_0 = arith.constant 0 : i32
    %c0_i32_1 = arith.constant 0 : i32
    %c0_i32_2 = arith.constant 0 : i32
    return %c0_i32, %c0_i32_0, %c0_i32_1 : i32, i32, i32
  }
  func.func @transform_5(%arg0: i32) -> (i32, i32, i32) {
    %c0_i32 = arith.constant 0 : i32
    %c0_i32_0 = arith.constant 0 : i32
    %c0_i32_1 = arith.constant 0 : i32
    %c0_i32_2 = arith.constant 0 : i32
    return %c0_i32, %c0_i32_0, %c0_i32_1 : i32, i32, i32
  }
  func.func @transform_6(%arg0: i32) -> (i32, i32, i32) {
    %c0_i32 = arith.constant 0 : i32
    %c0_i32_0 = arith.constant 0 : i32
    %c0_i32_1 = arith.constant 0 : i32
    %c0_i32_2 = arith.constant 0 : i32
    return %c0_i32, %c0_i32_0, %c0_i32_1 : i32, i32, i32
  }
  func.func @transform_7(%arg0: i32) -> (i32, i32, i32) {
    %c0_i32 = arith.constant 0 : i32
    %c0_i32_0 = arith.constant 0 : i32
    %c0_i32_1 = arith.constant 0 : i32
    %c0_i32_2 = arith.constant 0 : i32
    return %c0_i32, %c0_i32_0, %c0_i32_1 : i32, i32, i32
  }
  func.func @transform_8(%arg0: i32) -> (i32, i32, i32) {
    %c0_i32 = arith.constant 0 : i32
    %c0_i32_0 = arith.constant 0 : i32
    %c0_i32_1 = arith.constant 0 : i32
    %c0_i32_2 = arith.constant 0 : i32
    return %c0_i32, %c0_i32_0, %c0_i32_1 : i32, i32, i32
  }
  func.func @transform_9(%arg0: i32) -> (i32, i32) {
    %c0_i32 = arith.constant 0 : i32
    %c0_i32_0 = arith.constant 0 : i32
    %c0_i32_1 = arith.constant 0 : i32
    return %c0_i32, %c0_i32_0 : i32, i32
  }
  func.func @transform_10(%arg0: i32) -> (i32, i32) {
    %c0_i32 = arith.constant 0 : i32
    %c0_i32_0 = arith.constant 0 : i32
    %c0_i32_1 = arith.constant 0 : i32
    return %c0_i32, %c0_i32_0 : i32, i32
  }
  func.func @transform_11(%arg0: i32) -> (i32, i32, i32) {
    %c0_i32 = arith.constant 0 : i32
    %c0_i32_0 = arith.constant 0 : i32
    %c0_i32_1 = arith.constant 0 : i32
    return %arg0, %c0_i32, %c0_i32_0 : i32, i32, i32
  }
}

</mosaic_0001>

<bundles_post_ra>
// kernel: tpu_custom_call.1
= control target key start
LH: loop header
LB: loop body
LE: loop exit
PB: predicated region body
PF: predicated region fallthrough
CT: control target
= control target key end

     0   :  { %s2105_s17 = smov 0   ;;  %s2278_s0 = inlined_call_operand.vmem [shape: f32[6,8,4], index: 0, kind: input, shape index: {}]   ;;  %s2279_s1 = inlined_call_operand.vmem [shape: f32[2,8,32], index: 1, kind: input, shape index: {}]   ;;  %s2280_s2 = inlined_call_operand.vmem [shape: f32[2,1,32], index: 2, kind: input, shape index: {}]   ;;  %s2281_s3 = inlined_call_operand.vmem [shape: f32[2,32,8], index: 3, kind: input, shape index: {}]   ;;  %s2282_s4 = inlined_call_operand.vmem [shape: f32[2,1,8], index: 4, kind: input, shape index: {}]   ;;  %s2283_s5 = inlined_call_operand.vmem [shape: f32[2,4,32], index: 5, kind: input, shape index: {}]   ;;  %s2284_s6 = inlined_call_operand.vmem [shape: f32[2,1,32], index: 6, kind: input, shape index: {}]   ;;  %s2285_s7 = inlined_call_operand.vmem [shape: f32[2,32,4], index: 7, kind: input, shape index: {}]   ;;  %s2286_s8 = inlined_call_operand.vmem [shape: f32[2,1,4], index: 8, kind: input, shape index: {}]   ;;  %s2287_s9 = inlined_call_operand.vmem [shape: f32[8,4], index: 9, kind: input, shape index: {}]   ;;  %s2288_s10 = inlined_call_operand.vmem [shape: f32[1,4], index: 10, kind: input, shape index: {}]   ;;  %s2289_s11 = inlined_call_operand.vmem [shape: f32[6,4,4], index: 11, kind: output, shape index: {}]  }
   0x1 LB: > { %s1833_s18 = sadd.s32 4294967295, %s2041_s17   ;;  %p1837_p0 = scmp.ge.s32.totalorder %s2041_s17, 1  ;;  %s2041_s17 = sphi %s2105_s17, %s21_s17  }
   0x2   : > { %p338_p1 = scmp.lt.s32.totalorder %s2041_s17, 3 }
   0x4   : > { %p339_p2 = pnand %p1837_p0, %p338_p1 }
   0x5   : > { %s378_s19 = smul.u32 (!%p339_p2), 3, %s1833_s18 }
   0x6   : > { %342 = sbr.rel (%p339_p2) target bundleno = 2449 (0x991), region = 64 }
   0x7   : > { %p379_p3 = scmp.lt.s32.totalorder (!%p339_p2), %s378_s19, 5 }
   0xb   : > { %s2291_s19 = smov (!%p379_p3, %s378_s19), 5  ;;  %v489_v3 = vld [vmem:[%s2279_s1] sm:$0xff]  ;;  %vm501_vm0 = vcmask 64512   ;;  %v586_v8 = vld [vmem:[%s2281_s3 + $0x18] sm:$0xff]  ;;  %v585_v9 = vld [vmem:[%s2281_s3 + $0x10] sm:$0xff]  ;;  %vm594_vm1 = vcmask 261120  }
   0xc   : > { %s1838_s20 = sshll.u32 %s2291_s19, 3  ;;  %1932 = vmatprep.subr.mxu0 %v489_v3  ;;  %1937 = vmatprep.subr.mxu1 %v586_v8  ;;  %v584_v10 = vld [vmem:[%s2281_s3 + $0x8] sm:$0xff]  ;;  %v583_v11 = vld [vmem:[%s2281_s3] sm:$0xff]  ;;  %vm796_vm2 = vcmask 1043456   ;;  %v2043_v20 = vmov 0.0   ;;  %vm2044_vm3 = vmmov 0  }
   0xd   : > { %s382_s23 = scalar_lea.vmem %s2278_s0, %s1838_s20  ;;  %1933 = vmatpush3.msra.mxu0 %v489_v3  ;;  %1938 = vmatpush3.msra.mxu1 %v586_v8  ;;  %v1840_v12 = vld [vmem:[%s2280_s2] ss:$0 sm:$0xff]  ;;  %v886_v27 = vld [vmem:[%s2285_s7 + $0x18] sm:$0xff]  ;;  %vm786_vm4 = vcmask 31744   ;;  %v885_v34 = vld [vmem:[%s2285_s7 + $0x10] sm:$0xff]  ;;  %s1839_s12 = sshll.u32 %s2291_s19, 2 }
   0xe   : > { %v390_v0 = vld [vmem:[%s382_s23] sm:$0xff]  ;;  %v2119_v1 = vld [vmem:[%s382_s23 + $0x10] sm:$0xff]  ;;  %v391_v2 = vld [vmem:[%s382_s23 + $0x8] sm:$0xff]  ;;  %1939 = vmatprep.subr.mxu1 %v585_v9  ;;  %1948 = vmatprep.subr.mxu0 %v2043_v20  ;;  %s388_s18 = scalar_lea.vmem %s2289_s11, %s1839_s12  ;;  %vm1773_vm5 = vcmask 27648  }
   0xf   : > { %393 = vxpose.xlu0.b32.start.end [1/1] (short) (narrow) %v390_v0, 8  ;;  %457 = vxpose.xlu1.b32.start.end [1/1] (short) (narrow) %v2119_v1, 8  ;;  %v778_v19 = vld [vmem:[%s2283_s5] sm:$0xf]  ;;  %v884_v35 = vld [vmem:[%s2285_s7 + $0x8] sm:$0xff] }
  0x10   : > { %1940 = vmatpush3.msra.mxu1 %v585_v9  ;;  %v1843_v22 = vld [vmem:[%s2282_s4] ss:$0 sm:$0xff]  ;;  %v1855_v50 = vld [vmem:[%s2279_s1 + $0x8] sm:$0xff]  ;;  %v1857_v8 = vld [vmem:[%s2280_s2 + $0x1] ss:$0 sm:$0xff] }
  0x11   : > { %1941 = vmatprep.subr.mxu1 %v584_v10  ;;  %v883_v36 = vld [vmem:[%s2285_s7] sm:$0xff] }
  0x12   : > { %1942 = vmatpush3.msra.mxu1 %v584_v10  ;;  %v1846_v37 = vld [vmem:[%s2284_s6] ss:$0 sm:$0xff] }
  0x13   : > { %425 = vxpose.xlu0.b32.start.end [1/1] (short) (narrow) %v391_v2, 8  ;;  %1943 = vmatprep.subr.mxu1 %v583_v11  ;;  %v1851_v51 = vld [vmem:[%s2286_s8] ss:$0 sm:$0xff] }
  0x14   : > { %1944 = vmatpush3.msra.mxu1 %v583_v11 }
  0x15   : > { %1959 = vmatprep.subr.mxu1 %v2043_v20 }
  0x8b   : > { %v409_v4 = vpop.trf.xlu0  ;;  %v473_v7 = vpop.trf.xlu1 }
  0x8f   : > { %v441_v5 = vpop.trf.xlu0 }
  0x90   : > { %v500_v6 = vcombine.low %v409_v4, %v441_v5  ;;  %v1863_v4 = vld [vmem:[%s2281_s3 + $0x38] sm:$0xff]  ;;  %v1862_v5 = vld [vmem:[%s2281_s3 + $0x30] sm:$0xff] }
  0x92   : > { %1934 = vmatprep.mubr.msk.f32.mxu0 %vm501_vm0, %v500_v6  ;;  %v1861_v6 = vld [vmem:[%s2281_s3 + $0x28] sm:$0xff] }
  0x93   : > { %1935 = vmatmul.mubr.msk.f32.vlgmr.msra.gmra.mxu0 %vm501_vm0, %v473_v7  ;;  %v1860_v7 = vld [vmem:[%s2281_s3 + $0x20] sm:$0xff] }
  0x94   : > { %1949 = vmatpush3.msk.msra.mxu0 %vm796_vm2, %v778_v19  ;;  %1950 = vmatprep.mubr.msk.f32.mxu0 %vm2044_vm3, %v2043_v20 }
  0x95   : > { %1976 = vmatprep.subr.mxu0 %v1855_v50 }
 0x153   : > { %v1936_v13 = vpop.f32.mrf.mxu0 }
 0x154   : > { %v578_v14 = vadd.f32 %v1936_v13, %v1840_v12 }
 0x155   : > { %v572_v15 = vpop.f32.mrf.mxu0 }
 0x156   : > { %v573_v16 = vadd.f32 %v1840_v12, %v572_v15  ;;  %v582_v18 = vmax.f32 %v578_v14, 0.0  ;;  %v1868_v15 = vld [vmem:[%s2283_s5 + $0x4] sm:$0xf] }
 0x158   : > { %v581_v17 = vmax.f32 %v573_v16, 0.0 }
 0x15a   : > { %1945 = vmatprep.mubr.msk.f32.mxu1 %vm594_vm1, %v581_v17  ;;  %v1865_v17 = vld [vmem:[%s2282_s4 + $0x1] ss:$0 sm:$0xff] }
 0x15b   : > { %1946 = vmatmul.mubr.msk.f32.vlgmr.msra.gmra.mxu1 %vm594_vm1, %v582_v18 }
 0x15c   : > { %1967 = vmatprep.mubr.msk.f32.mxu1 %vm2044_vm3, %v2043_v20  ;;  %1960 = vmatpush3.msra.mxu1 %v886_v27 }
 0x15d   : > { %1961 = vmatprep.subr.mxu1 %v2043_v20 }
 0x15e   : > { %1962 = vmatpush3.msra.mxu1 %v885_v34 }
 0x15f   : > { %1963 = vmatprep.subr.mxu1 %v2043_v20 }
 0x160   : > { %1964 = vmatpush3.msra.mxu1 %v884_v35 }
 0x161   : > { %1965 = vmatprep.subr.mxu1 %v2043_v20 }
 0x162   : > { %1966 = vmatpush3.msra.mxu1 %v883_v36 }
 0x163   : > { %1992 = vmatprep.subr.mxu1 %v2043_v20 }
 0x21b   : > { %v1947_v21 = vpop.f32.mrf.mxu1 }
 0x21c   : > { %v673_v26 = vadd.f32 %v1947_v21, %v1843_v22 }
 0x21d   : > { %v667_v23 = vpop.f32.mrf.mxu1 }
 0x21e   : > { %v668_v24 = vadd.f32 %v1843_v22, %v667_v23  ;;  %v1878_v23 = vld [vmem:[%s2285_s7 + $0x38] sm:$0xff] }
 0x220   : > { %679 = vxpose.xlu1.b32.start.end [1/1] (short) (narrow) %v668_v24, 8  ;;  %v677_v25 = vcombine.high %v668_v24, %v668_v24 }
 0x222   : > { %711 = vxpose.xlu0.b32.start.end [1/1] (short) (narrow) %v677_v25, 8 }
 0x224   : > { %743 = vxpose.xlu1.b32.start.end [1/1] (short) (narrow) %v673_v26, 8 }
 0x29c   : > { %v695_v28 = vpop.trf.xlu1 }
 0x29d   : > { %v775_v29 = vadd.f32 %v695_v28, %v390_v0 }
 0x29e   : > { %v727_v30 = vpop.trf.xlu0 }
 0x29f   : > { %1951 = vmatmul.mubr.msk.f32.vlgmr.msra.gmra.mxu0 %vm786_vm4, %v775_v29  ;;  %v776_v31 = vadd.f32 %v727_v30, %v391_v2  ;;  %v1877_v30 = vld [vmem:[%s2285_s7 + $0x30] sm:$0xff] }
 0x2a0   : > { %1953 = vmatprep.mubr.msk.f32.mxu0 %vm2044_vm3, %v2043_v20  ;;  %v759_v32 = vpop.trf.xlu1  ;;  %1977 = vmatpush3.msra.mxu0 %v1855_v50 }
 0x2a1   : > { %v777_v33 = vadd.f32 %v759_v32, %v2119_v1  ;;  %1981 = vmatprep.subr.mxu0 %v1863_v4  ;;  %v1875_v32 = vld [vmem:[%s2285_s7 + $0x20] sm:$0xff] }
 0x2a3   : > { %1954 = vmatmul.mubr.msk.f32.gmra.mxu0 %vm786_vm4, %v776_v31 }
 0x2a4   : > { %1956 = vmatprep.mubr.msk.f32.mxu0 %vm2044_vm3, %v2043_v20 }
 0x2a7   : > { %1957 = vmatmul.mubr.msk.f32.gmra.mxu0 %vm786_vm4, %v777_v33 }
 0x35f   : > { %v866_v38 = vpop.f32.mrf.mxu0 }
 0x360   : > { %v867_v39 = vadd.f32 %v1846_v37, %v866_v38 }
 0x361   : > { %v1952_v40 = vpop.f32.mrf.mxu0 }
 0x362   : > { %v880_v41 = vmax.f32 %v867_v39, 0.0 }
 0x363   : > { %v871_v42 = vpop.f32.mrf.mxu0 }
 0x364   : > { %v872_v43 = vadd.f32 %v1846_v37, %v871_v42  ;;  %1968 = vmatmul.mubr.msk.f32.vlgmr.msra.gmra.mxu1 %vm594_vm1, %v880_v41 }
 0x365   : > { %v1955_v44 = vpop.f32.mrf.mxu0  ;;  %1970 = vmatprep.mubr.msk.f32.mxu1 %vm2044_vm3, %v2043_v20  ;;  %1993 = vmatpush3.msk.msra.mxu1 %vm796_vm2, %v1868_v15 }
 0x366   : > { %v881_v45 = vmax.f32 %v872_v43, 0.0 }
 0x367   : > { %v876_v46 = vpop.f32.mrf.mxu0 }
 0x368   : > { %v877_v47 = vadd.f32 %v1846_v37, %v876_v46  ;;  %1971 = vmatmul.mubr.msk.f32.gmra.mxu1 %vm594_vm1, %v881_v45  ;;  %v1679_v46 = vld [vmem:[%s2287_s9] sm:$0xff] }
 0x369   : > { %v1958_v48 = vpop.f32.mrf.mxu0  ;;  %1973 = vmatprep.mubr.msk.f32.mxu1 %vm2044_vm3, %v2043_v20  ;;  %2020 = vmatprep.subr.mxu1 %v1679_v46 }
 0x36a   : > { %v882_v49 = vmax.f32 %v877_v47, 0.0  ;;  %v1880_v47 = vld [vmem:[%s2286_s8 + $0x1] ss:$0 sm:$0xff] }
 0x36c   : > { %1974 = vmatmul.mubr.msk.f32.gmra.mxu1 %vm594_vm1, %v882_v49 }
 0x36d   : > { %1994 = vmatprep.mubr.msk.f32.mxu1 %vm2044_vm3, %v2043_v20 }
 0x424   : > { %v969_v52 = vpop.f32.mrf.mxu1 }
 0x425   : > { %v970_v53 = vadd.f32 %v1851_v51, %v969_v52 }
 0x426   : > { %v1969_v54 = vpop.f32.mrf.mxu1 }
 0x427   : > { %v983_v55 = vadd.f32 %v970_v53, %v775_v29 }
 0x428   : > { %v974_v56 = vpop.f32.mrf.mxu1 }
 0x429   : > { %v975_v57 = vadd.f32 %v1851_v51, %v974_v56  ;;  %986 = vxpose.xlu0.b32.start.end [1/1] (short) (narrow) %v983_v55, 8 }
 0x42a   : > { %v1972_v58 = vpop.f32.mrf.mxu1 }
 0x42b   : > { %v984_v59 = vadd.f32 %v975_v57, %v776_v31  ;;  %v1876_v31 = vld [vmem:[%s2285_s7 + $0x28] sm:$0xff] }
 0x42c   : > { %v979_v60 = vpop.f32.mrf.mxu1 }
 0x42d   : > { %v980_v61 = vadd.f32 %v1851_v51, %v979_v60  ;;  %1018 = vxpose.xlu1.b32.start.end [1/1] (short) (narrow) %v984_v59, 8 }
 0x42e   : > { %v1975_v62 = vpop.f32.mrf.mxu1 }
 0x42f   : > { %v985_v63 = vadd.f32 %v980_v61, %v777_v33  ;;  %v1870_v33 = vld [vmem:[%s2284_s6 + $0x1] ss:$0 sm:$0xff] }
 0x431   : > { %1050 = vxpose.xlu0.b32.start.end [1/1] (short) (narrow) %v985_v63, 8 }
 0x4a5   : > { %v1002_v0 = vpop.trf.xlu0 }
 0x4a9   : > { %v1034_v1 = vpop.trf.xlu1 }
 0x4aa   : > { %v1095_v2 = vcombine.low %v1002_v0, %v1034_v1 }
 0x4ac   : > { %1978 = vmatprep.mubr.msk.f32.mxu0 %vm501_vm0, %v1095_v2 }
 0x4ad   : > { %v1066_v3 = vpop.trf.xlu0 }
 0x4ae   : > { %1979 = vmatmul.mubr.msk.f32.vlgmr.msra.gmra.mxu0 %vm501_vm0, %v1066_v3 }
 0x4af   : > { %1982 = vmatpush3.msra.mxu0 %v1863_v4 }
 0x4b0   : > { %1983 = vmatprep.subr.mxu0 %v1862_v5 }
 0x4b1   : > { %1984 = vmatpush3.msra.mxu0 %v1862_v5 }
 0x4b2   : > { %1985 = vmatprep.subr.mxu0 %v1861_v6 }
 0x4b3   : > { %1986 = vmatpush3.msra.mxu0 %v1861_v6 }
 0x4b4   : > { %1987 = vmatprep.subr.mxu0 %v1860_v7 }
 0x4b5   : > { %1988 = vmatpush3.msra.mxu0 %v1860_v7 }
 0x4b6   : > { %2003 = vmatprep.subr.mxu0 %v2043_v20 }
 0x56e   : > { %v1980_v9 = vpop.f32.mrf.mxu0 }
 0x56f   : > { %v1172_v10 = vadd.f32 %v1980_v9, %v1857_v8 }
 0x570   : > { %v1166_v11 = vpop.f32.mrf.mxu0 }
 0x571   : > { %v1167_v12 = vadd.f32 %v1857_v8, %v1166_v11  ;;  %v1176_v14 = vmax.f32 %v1172_v10, 0.0 }
 0x573   : > { %v1175_v13 = vmax.f32 %v1167_v12, 0.0 }
 0x575   : > { %1989 = vmatprep.mubr.msk.f32.mxu0 %vm594_vm1, %v1175_v13 }
 0x576   : > { %1990 = vmatmul.mubr.msk.f32.vlgmr.msra.gmra.mxu0 %vm594_vm1, %v1176_v14 }
 0x577   : > { %2011 = vmatprep.mubr.msk.f32.mxu0 %vm2044_vm3, %v2043_v20  ;;  %2004 = vmatpush3.msra.mxu0 %v1878_v23 }
 0x578   : > { %2005 = vmatprep.subr.mxu0 %v2043_v20 }
 0x579   : > { %2006 = vmatpush3.msra.mxu0 %v1877_v30 }
 0x57a   : > { %2007 = vmatprep.subr.mxu0 %v2043_v20 }
 0x57b   : > { %2008 = vmatpush3.msra.mxu0 %v1876_v31 }
 0x57c   : > { %2009 = vmatprep.subr.mxu0 %v2043_v20 }
 0x57d   : > { %2010 = vmatpush3.msra.mxu0 %v1875_v32 }
 0x636   : > { %v1991_v16 = vpop.f32.mrf.mxu0 }
 0x637   : > { %v1268_v22 = vadd.f32 %v1991_v16, %v1865_v17 }
 0x638   : > { %v1262_v18 = vpop.f32.mrf.mxu0 }
 0x639   : > { %v1263_v19 = vadd.f32 %v1865_v17, %v1262_v18 }
 0x63b   : > { %1274 = vxpose.xlu1.b32.start.end [1/1] (short) (narrow) %v1263_v19, 8  ;;  %v1272_v21 = vcombine.high %v1263_v19, %v1263_v19 }
 0x63d   : > { %1306 = vxpose.xlu0.b32.start.end [1/1] (short) (narrow) %v1272_v21, 8 }
 0x63f   : > { %1338 = vxpose.xlu1.b32.start.end [1/1] (short) (narrow) %v1268_v22, 8 }
 0x6b7   : > { %v1290_v24 = vpop.trf.xlu1 }
 0x6b8   : > { %v1370_v25 = vadd.f32 %v1290_v24, %v983_v55 }
 0x6b9   : > { %v1322_v26 = vpop.trf.xlu0 }
 0x6ba   : > { %1995 = vmatmul.mubr.msk.f32.vlgmr.msra.gmra.mxu1 %vm786_vm4, %v1370_v25  ;;  %v1371_v27 = vadd.f32 %v1322_v26, %v984_v59 }
 0x6bb   : > { %1997 = vmatprep.mubr.msk.f32.mxu1 %vm2044_vm3, %v2043_v20  ;;  %v1354_v28 = vpop.trf.xlu1  ;;  %2021 = vmatpush3.msra.mxu1 %v1679_v46 }
 0x6bc   : > { %v1372_v29 = vadd.f32 %v1354_v28, %v985_v63  ;;  %v1884_v63 = vld [vmem:[%s2288_s10] ss:$0 sm:$0xff] }
 0x6be   : > { %1998 = vmatmul.mubr.msk.f32.gmra.mxu1 %vm786_vm4, %v1371_v27 }
 0x6bf   : > { %2000 = vmatprep.mubr.msk.f32.mxu1 %vm2044_vm3, %v2043_v20 }
 0x6c2   : > { %2001 = vmatmul.mubr.msk.f32.gmra.mxu1 %vm786_vm4, %v1372_v29 }
 0x77a   : > { %v1461_v34 = vpop.f32.mrf.mxu1 }
 0x77b   : > { %v1462_v35 = vadd.f32 %v1870_v33, %v1461_v34 }
 0x77c   : > { %v1996_v36 = vpop.f32.mrf.mxu1 }
 0x77d   : > { %v1475_v37 = vmax.f32 %v1462_v35, 0.0 }
 0x77e   : > { %v1466_v38 = vpop.f32.mrf.mxu1 }
 0x77f   : > { %v1467_v39 = vadd.f32 %v1870_v33, %v1466_v38  ;;  %2012 = vmatmul.mubr.msk.f32.vlgmr.msra.gmra.mxu0 %vm594_vm1, %v1475_v37 }
 0x780   : > { %v1999_v40 = vpop.f32.mrf.mxu1  ;;  %2014 = vmatprep.mubr.msk.f32.mxu0 %vm2044_vm3, %v2043_v20 }
 0x781   : > { %v1476_v41 = vmax.f32 %v1467_v39, 0.0 }
 0x782   : > { %v1471_v42 = vpop.f32.mrf.mxu1 }
 0x783   : > { %v1472_v43 = vadd.f32 %v1870_v33, %v1471_v42  ;;  %2015 = vmatmul.mubr.msk.f32.gmra.mxu0 %vm594_vm1, %v1476_v41 }
 0x784   : > { %v2002_v44 = vpop.f32.mrf.mxu1  ;;  %2017 = vmatprep.mubr.msk.f32.mxu0 %vm2044_vm3, %v2043_v20 }
 0x785   : > { %v1477_v45 = vmax.f32 %v1472_v43, 0.0 }
 0x787   : > { %2018 = vmatmul.mubr.msk.f32.gmra.mxu0 %vm594_vm1, %v1477_v45 }
 0x83f   : > { %v1566_v48 = vpop.f32.mrf.mxu0 }
 0x840   : > { %v1567_v49 = vadd.f32 %v1880_v47, %v1566_v48 }
 0x841   : > { %v2013_v50 = vpop.f32.mrf.mxu0 }
 0x842   : > { %v1580_v51 = vadd.f32 %v1567_v49, %v1370_v25 }
 0x843   : > { %v1571_v52 = vpop.f32.mrf.mxu0 }
 0x844   : > { %v1572_v53 = vadd.f32 %v1880_v47, %v1571_v52  ;;  %1583 = vxpose.xlu0.b32.start.end [1/1] (short) (narrow) %v1580_v51, 8 }
 0x845   : > { %v2016_v20 = vpop.f32.mrf.mxu0 }
 0x846   : > { %v1581_v54 = vadd.f32 %v1572_v53, %v1371_v27 }
 0x847   : > { %v1576_v55 = vpop.f32.mrf.mxu0 }
 0x848   : > { %v1577_v56 = vadd.f32 %v1880_v47, %v1576_v55  ;;  %1615 = vxpose.xlu1.b32.start.end [1/1] (short) (narrow) %v1581_v54, 8 }
 0x849   : > { %v2019_v57 = vpop.f32.mrf.mxu0 }
 0x84a   : > { %v1582_v58 = vadd.f32 %v1577_v56, %v1372_v29 }
 0x84c   : > { %1647 = vxpose.xlu0.b32.start.end [1/1] (short) (narrow) %v1582_v58, 8 }
 0x8c0   : > { %v1599_v59 = vpop.trf.xlu0 }
 0x8c4   : > { %v1631_v60 = vpop.trf.xlu1 }
 0x8c5   : > { %v1690_v61 = vcombine.low %v1599_v59, %v1631_v60 }
 0x8c7   : > { %2022 = vmatprep.mubr.msk.f32.mxu1 %vm501_vm0, %v1690_v61 }
 0x8c8   : > { %v1663_v62 = vpop.trf.xlu0 }
 0x8c9   : > { %2023 = vmatmul.mubr.msk.f32.vlgmr.msra.gmra.mxu1 %vm501_vm0, %v1663_v62 }
 0x989   : > { %v2024_v0 = vpop.f32.mrf.mxu1 }
 0x98a   : > { %v1767_v1 = vadd.f32 %v2024_v0, %v1884_v63 }
 0x98b   : > { %v1761_v2 = vpop.f32.mrf.mxu1 }
 0x98c   : > { %1776 = vst.msk [vmem:[%s388_s18 + $0x8] sm:$0xf] %vm1773_vm5, %v1767_v1  ;;  %v1762_v3 = vadd.f32 %v1884_v63, %v1761_v2 }
 0x98e   : > { %v1771_v4 = vcombine.high %v1762_v3, %v1762_v3  ;;  %1774 = vst.msk [vmem:[%s388_s18] sm:$0xf] %vm1773_vm5, %v1762_v3 }
 0x990   : > { %1775 = vst.msk [vmem:[%s388_s18 + $0x4] sm:$0xf] %vm1773_vm5, %v1771_v4 }
 0x991 PF: > { %s21_s17 = sadd.s32 1, %s2041_s17  }
 0x992   : > { %p18_p4 = scmp.ge.s32.totalorder %s21_s17, 4  }
 0x994   :  { %20 = sbr.rel (!%p18_p4) target bundleno = 1 (0x1), region = 102 }

</bundles_post_ra>
